<compile_context>
chip_gen: v7x
topology: tpu7x:2x2x1
jax: 0.10.0
libtpu: 0.0.40
codegen_flags: <defaults>
</compile_context>

<pallas_src>
import functools

import jax
import jax.numpy as jnp
from jax.experimental import pallas as pl
from jax.experimental.pallas import tpu as pltpu

EMBEDDING_DIM = 512
NEG_SLOPE = 0.2
LANE = 128


# ----------------------------- Pallas kernel ------------------------------ #
def _leaky_relu(x, neg_slope):
    return jnp.where(x > 0, x, neg_slope * x)


def _gcn_fused_kernel(x_ref, a_ref, w1_ref, b1_ref, w2_ref, b2_ref,
                      w3_ref, b3_ref, o_ref, *, neg_slope):
    """Entire 3-layer GCN forward; all operands are whole-array VMEM blocks.

    x/a/w refs are bf16; biases are f32; accumulation is f32 on the MXU.
    """
    a = a_ref[...]                                        # (N, N) bf16 normalized adjacency

    # ---- conv1: LeakyReLU(A_hat @ (X @ W1) + b1) ---------------------------
    h = jnp.dot(x_ref[...], w1_ref[...], preferred_element_type=jnp.float32)
    h = jnp.dot(a, h.astype(jnp.bfloat16),
                preferred_element_type=jnp.float32) + b1_ref[...]
    h = _leaky_relu(h, neg_slope)
    # dropout(p=0.3) is identity in eval mode (training=False)

    # ---- conv2: LeakyReLU(A_hat @ (H @ W2) + b2) ---------------------------
    h = jnp.dot(h.astype(jnp.bfloat16), w2_ref[...],
                preferred_element_type=jnp.float32)
    h = jnp.dot(a, h.astype(jnp.bfloat16),
                preferred_element_type=jnp.float32) + b2_ref[...]
    h = _leaky_relu(h, neg_slope)
    # dropout(p=0.3) is identity in eval mode (training=False)

    # ---- conv3: A_hat @ (H @ W3) + b3 (no activation) ----------------------
    h = jnp.dot(h.astype(jnp.bfloat16), w3_ref[...],
                preferred_element_type=jnp.float32)
    h = jnp.dot(a, h.astype(jnp.bfloat16),
                preferred_element_type=jnp.float32) + b3_ref[...]
    o_ref[...] = h.astype(o_ref.dtype)


def _pad_axis(m, axis, target):
    pad = [(0, 0)] * m.ndim
    pad[axis] = (0, target - m.shape[axis])
    return jnp.pad(m, pad)


@jax.jit
def gcn_forward(x, a_hat, w1, b1, w2, b2, w3, b3):
    """Fused forward: single grid-less pallas_call, everything VMEM-resident."""
    n_nodes, in_dim = x.shape
    d1 = w1.shape[1]
    out_dim = w3.shape[1]

    # Lane-dense padding for conv2/conv3 feature dims (zero columns/rows so
    # the padded output columns are exactly zero -> sliced off afterwards).
    d2p = max(LANE, -(-w2.shape[1] // LANE) * LANE)
    d3p = max(LANE, -(-w3.shape[1] // LANE) * LANE)
    w2p = _pad_axis(w2, 1, d2p)                                   # (d1,  d2p)
    b2p = _pad_axis(b2, 0, d2p)
    w3p = _pad_axis(_pad_axis(w3, 0, d2p), 1, d3p)                # (d2p, d3p)
    b3p = _pad_axis(b3, 0, d3p)

    # bf16 MXU operands (f32 accumulation inside the kernel); biases stay f32.
    xb = x.astype(jnp.bfloat16)
    ab = a_hat.astype(jnp.bfloat16)
    w1b, w2b, w3b = (w.astype(jnp.bfloat16) for w in (w1, w2p, w3p))
    b1r = b1.reshape(1, -1)
    b2r = b2p.reshape(1, -1)
    b3r = b3p.reshape(1, -1)

    # Advisory cost estimate (kernel is tiny and latency-bound).
    flops = 2 * n_nodes * (in_dim * d1 + n_nodes * d1
                           + d1 * d2p + n_nodes * d2p
                           + d2p * d3p + n_nodes * d3p)
    bytes_accessed = (xb.size + ab.size + w1b.size + w2b.size + w3b.size) * 2 \
        + (b1r.size + b2r.size + b3r.size) * 4 + n_nodes * d3p * 4

    vmem = functools.partial(pl.BlockSpec, memory_space=pltpu.MemorySpace.VMEM)
    kernel = functools.partial(_gcn_fused_kernel, neg_slope=NEG_SLOPE)

    out = pl.pallas_call(
        kernel,
        out_shape=jax.ShapeDtypeStruct((n_nodes, d3p), jnp.float32),
        in_specs=[vmem() for _ in range(8)],
        out_specs=vmem(),
        cost_estimate=pl.CostEstimate(flops=flops, transcendentals=0,
                                      bytes_accessed=bytes_accessed),
    )(xb, ab, w1b, b1r, w2b, b2r, w3b, b3r)

    # TODO(synk): for repeated graphs, add a leading batch grid axis (weights
    # resident, x/A_hat pipelined, "parallel" to shard across v7x's 2 TCs).
    return out[:, :out_dim]


# -------------------------- graph preprocessing --------------------------- #
def normalized_adjacency(edge_index, num_nodes):
    """D^{-1/2} (A + I) D^{-1/2} with to_undirected + self loops."""
    src, dst = edge_index[0], edge_index[1]
    a = jnp.zeros((num_nodes, num_nodes), jnp.float32)
    a = a.at[src, dst].set(1.0)
    a = a.at[dst, src].set(1.0)                                   # to_undirected
    a = jnp.maximum(a, jnp.eye(num_nodes, dtype=jnp.float32))     # add self loops
    deg = a.sum(axis=1)
    d_inv_sqrt = jnp.where(deg > 0, 1.0 / jnp.sqrt(deg), 0.0)
    return d_inv_sqrt[:, None] * a * d_inv_sqrt[None, :]


def glorot(key, fan_in, fan_out):
    limit = jnp.sqrt(6.0 / (fan_in + fan_out))
    return jax.random.uniform(key, (fan_in, fan_out), jnp.float32, -limit, limit)


# --------------------------------- main ----------------------------------- #
if __name__ == "__main__":
    key = jax.random.PRNGKey(0)
    k_x, k_e1, k_e2, k_w1, k_w2, k_w3 = jax.random.split(key, 6)

    num_nodes = 128
    num_edges = 256

    # Node features (N, 512) and random edge_index (2, E) with no self loops.
    x = jax.random.normal(k_x, (num_nodes, EMBEDDING_DIM), jnp.float32)
    src = jax.random.randint(k_e1, (num_edges,), 0, num_nodes)
    off = jax.random.randint(k_e2, (num_edges,), 1, num_nodes)
    dst = (src + off) % num_nodes            # guarantees src != dst
    edge_index = jnp.stack([src, dst], axis=0)

    a_hat = normalized_adjacency(edge_index, num_nodes)

    # Deterministic parameter init: GCNConv(512->128), (128->64), (64->64).
    w1, b1 = glorot(k_w1, EMBEDDING_DIM, 128), jnp.zeros((128,), jnp.float32)
    w2, b2 = glorot(k_w2, 128, 64), jnp.zeros((64,), jnp.float32)
    w3, b3 = glorot(k_w3, 64, 64), jnp.zeros((64,), jnp.float32)

    out = jax.block_until_ready(gcn_forward(x, a_hat, w1, b1, w2, b2, w3, b3))

    # Pure-JAX f32 reference; tolerance relaxed because the kernel uses bf16
    # MXU operands (f32 accumulation).
    def ref_forward(x, a_hat, params):
        h = x
        for i, (w, b) in enumerate(params):
            h = a_hat @ (h @ w) + b
            if i < 2:
                h = jnp.where(h > 0, h, NEG_SLOPE * h)
        return h

    ref = ref_forward(x, a_hat, [(w1, b1), (w2, b2), (w3, b3)])
    assert out.shape == (num_nodes, 64)
    assert jnp.allclose(out, ref, rtol=5e-2, atol=5e-2)

    # TODO(synk): GCN.decode (edge-pair dot-product scoring) is not part of
    # forward(); left out of the fused kernel.
    print("KERNEL_OK")
</pallas_src>

<mosaic_0001>
module attributes {stable_mosaic.version = 11 : i64} {
  func.func @_gcn_fused_kernel(%arg0: memref<128x512xbf16, #tpu.memory_space<vmem>>, %arg1: memref<128x128xbf16, #tpu.memory_space<vmem>>, %arg2: memref<512x128xbf16, #tpu.memory_space<vmem>>, %arg3: memref<1x128xf32, #tpu.memory_space<vmem>>, %arg4: memref<128x128xbf16, #tpu.memory_space<vmem>>, %arg5: memref<1x128xf32, #tpu.memory_space<vmem>>, %arg6: memref<128x128xbf16, #tpu.memory_space<vmem>>, %arg7: memref<1x128xf32, #tpu.memory_space<vmem>>, %arg8: memref<128x128xf32, #tpu.memory_space<vmem>>) attributes {dimension_semantics = [], scalar_prefetch = 0 : i64, scratch_operands = 0 : i64, tpu.core_type = #tpu.core_type<tc>} {
    %c0 = arith.constant 0 : index
    %c0_0 = arith.constant 0 : index
    %0 = vector.load %arg1[%c0, %c0_0] : memref<128x128xbf16, #tpu.memory_space<vmem>>, vector<128x128xbf16>
    %c0_1 = arith.constant 0 : index
    %c0_2 = arith.constant 0 : index
    %1 = vector.load %arg0[%c0_1, %c0_2] : memref<128x512xbf16, #tpu.memory_space<vmem>>, vector<128x512xbf16>
    %c0_3 = arith.constant 0 : index
    %c0_4 = arith.constant 0 : index
    %2 = vector.load %arg2[%c0_3, %c0_4] : memref<512x128xbf16, #tpu.memory_space<vmem>>, vector<512x128xbf16>
    %cst = arith.constant dense<0.000000e+00> : vector<128x128xf32>
    %3 = tpu.matmul %1, %2, %cst {dimension_numbers = #tpu.dot_dimension_numbers<[1], [0], [0], [1], [0, 0, 1, 1], [], []>} : vector<128x512xbf16>, vector<512x128xbf16>, vector<128x128xf32> -> vector<128x128xf32>
    %4 = arith.truncf %3 : vector<128x128xf32> to vector<128x128xbf16>
    %cst_5 = arith.constant dense<0.000000e+00> : vector<128x128xf32>
    %5 = tpu.matmul %0, %4, %cst_5 {dimension_numbers = #tpu.dot_dimension_numbers<[1], [0], [0], [1], [0, 0, 1, 1], [], []>} : vector<128x128xbf16>, vector<128x128xbf16>, vector<128x128xf32> -> vector<128x128xf32>
    %c0_6 = arith.constant 0 : index
    %c0_7 = arith.constant 0 : index
    %6 = vector.load %arg3[%c0_6, %c0_7] : memref<1x128xf32, #tpu.memory_space<vmem>>, vector<1x128xf32>
    %7 = vector.broadcast %6 : vector<1x128xf32> to vector<128x128xf32>
    %8 = arith.addf %5, %7 : vector<128x128xf32>
    %cst_8 = arith.constant 0.000000e+00 : f32
    %9 = vector.broadcast %cst_8 : f32 to vector<128x128xf32>
    %10 = arith.cmpf ogt, %8, %9 : vector<128x128xf32>
    %cst_9 = arith.constant 2.000000e-01 : f32
    %11 = vector.broadcast %cst_9 : f32 to vector<128x128xf32>
    %12 = arith.mulf %11, %8 : vector<128x128xf32>
    %13 = arith.select %10, %8, %12 : vector<128x128xi1>, vector<128x128xf32>
    %14 = arith.truncf %13 : vector<128x128xf32> to vector<128x128xbf16>
    %c0_10 = arith.constant 0 : index
    %c0_11 = arith.constant 0 : index
    %15 = vector.load %arg4[%c0_10, %c0_11] : memref<128x128xbf16, #tpu.memory_space<vmem>>, vector<128x128xbf16>
    %cst_12 = arith.constant dense<0.000000e+00> : vector<128x128xf32>
    %16 = tpu.matmul %14, %15, %cst_12 {dimension_numbers = #tpu.dot_dimension_numbers<[1], [0], [0], [1], [0, 0, 1, 1], [], []>} : vector<128x128xbf16>, vector<128x128xbf16>, vector<128x128xf32> -> vector<128x128xf32>
    %17 = arith.truncf %16 : vector<128x128xf32> to vector<128x128xbf16>
    %cst_13 = arith.constant dense<0.000000e+00> : vector<128x128xf32>
    %18 = tpu.matmul %0, %17, %cst_13 {dimension_numbers = #tpu.dot_dimension_numbers<[1], [0], [0], [1], [0, 0, 1, 1], [], []>} : vector<128x128xbf16>, vector<128x128xbf16>, vector<128x128xf32> -> vector<128x128xf32>
    %c0_14 = arith.constant 0 : index
    %c0_15 = arith.constant 0 : index
    %19 = vector.load %arg5[%c0_14, %c0_15] : memref<1x128xf32, #tpu.memory_space<vmem>>, vector<1x128xf32>
    %20 = vector.broadcast %19 : vector<1x128xf32> to vector<128x128xf32>
    %21 = arith.addf %18, %20 : vector<128x128xf32>
    %cst_16 = arith.constant 0.000000e+00 : f32
    %22 = vector.broadcast %cst_16 : f32 to vector<128x128xf32>
    %23 = arith.cmpf ogt, %21, %22 : vector<128x128xf32>
    %cst_17 = arith.constant 2.000000e-01 : f32
    %24 = vector.broadcast %cst_17 : f32 to vector<128x128xf32>
    %25 = arith.mulf %24, %21 : vector<128x128xf32>
    %26 = arith.select %23, %21, %25 : vector<128x128xi1>, vector<128x128xf32>
    %27 = arith.truncf %26 : vector<128x128xf32> to vector<128x128xbf16>
    %c0_18 = arith.constant 0 : index
    %c0_19 = arith.constant 0 : index
    %28 = vector.load %arg6[%c0_18, %c0_19] : memref<128x128xbf16, #tpu.memory_space<vmem>>, vector<128x128xbf16>
    %cst_20 = arith.constant dense<0.000000e+00> : vector<128x128xf32>
    %29 = tpu.matmul %27, %28, %cst_20 {dimension_numbers = #tpu.dot_dimension_numbers<[1], [0], [0], [1], [0, 0, 1, 1], [], []>} : vector<128x128xbf16>, vector<128x128xbf16>, vector<128x128xf32> -> vector<128x128xf32>
    %30 = arith.truncf %29 : vector<128x128xf32> to vector<128x128xbf16>
    %cst_21 = arith.constant dense<0.000000e+00> : vector<128x128xf32>
    %31 = tpu.matmul %0, %30, %cst_21 {dimension_numbers = #tpu.dot_dimension_numbers<[1], [0], [0], [1], [0, 0, 1, 1], [], []>} : vector<128x128xbf16>, vector<128x128xbf16>, vector<128x128xf32> -> vector<128x128xf32>
    %c0_22 = arith.constant 0 : index
    %c0_23 = arith.constant 0 : index
    %32 = vector.load %arg7[%c0_22, %c0_23] : memref<1x128xf32, #tpu.memory_space<vmem>>, vector<1x128xf32>
    %33 = vector.broadcast %32 : vector<1x128xf32> to vector<128x128xf32>
    %34 = arith.addf %31, %33 : vector<128x128xf32>
    %c0_24 = arith.constant 0 : index
    %c0_25 = arith.constant 0 : index
    %35 = vector.load %arg8[%c0_24, %c0_25] : memref<128x128xf32, #tpu.memory_space<vmem>>, vector<128x128xf32>
    tpu.vector_store %arg8[%c0_24, %c0_25], %34 {strides = array<i32>} : memref<128x128xf32, #tpu.memory_space<vmem>>, vector<128x128xf32>,
    return
  }
}

</mosaic_0001>

<bundles_post_ra>
// kernel: gcn_forward.1
= control target key start
LH: loop header
LB: loop body
LE: loop exit
PB: predicated region body
PF: predicated region fallthrough
CT: control target
= control target key end

     0   :  { %s2547_s2 = inlined_call_operand.vmem [shape: bf16[512,128], index: 2, kind: input, shape index: {}]   ;;  %s2548_s0 = inlined_call_operand.vmem [shape: bf16[128,512], index: 0, kind: input, shape index: {}]   ;;  %s2549_s1 = inlined_call_operand.vmem [shape: bf16[128,128], index: 1, kind: input, shape index: {}]   ;;  %s2550_s4 = inlined_call_operand.vmem [shape: bf16[128,128], index: 4, kind: input, shape index: {}]   ;;  %s2551_s3 = inlined_call_operand.vmem [shape: f32[1,128], index: 3, kind: input, shape index: {}]   ;;  %s2552_s6 = inlined_call_operand.vmem [shape: bf16[128,128], index: 6, kind: input, shape index: {}]   ;;  %s2553_s5 = inlined_call_operand.vmem [shape: f32[1,128], index: 5, kind: input, shape index: {}]   ;;  %s2554_s7 = inlined_call_operand.vmem [shape: f32[1,128], index: 7, kind: input, shape index: {}]   ;;  %s2555_s8 = inlined_call_operand.vmem [shape: f32[128,128], index: 8, kind: output, shape index: {}]  }
   0x1   :  { %v2001_v0 = vld [vmem:[%s2547_s2 + $0x40] sm:$0xff]   ;;  %v2005_v4 = vld [vmem:[%s2547_s2 + $0x48] sm:$0xff]   ;;  %v2009_v8 = vld [vmem:[%s2547_s2 + $0x50] sm:$0xff]  }
   0x2   :  { %v2002_v1 = vld [vmem:[%s2547_s2 + $0xc0] sm:$0xff]   ;;  %1617 = vmatprep.subr.bf16.mxu0 %v2001_v0  ;;  %v2006_v5 = vld [vmem:[%s2547_s2 + $0xc8] sm:$0xff]   ;;  %v2010_v9 = vld [vmem:[%s2547_s2 + $0xd0] sm:$0xff]  }
   0x3   :  { %v2003_v2 = vld [vmem:[%s2547_s2] sm:$0xff]   ;;  %1681 = vmatprep.subr.bf16.mxu1 %v2002_v1  ;;  %v2007_v6 = vld [vmem:[%s2547_s2 + $0x8] sm:$0xff]   ;;  %v2011_v10 = vld [vmem:[%s2547_s2 + $0x10] sm:$0xff]  }
   0x4   :  { %v2004_v3 = vld [vmem:[%s2547_s2 + $0x80] sm:$0xff]   ;;  %1618 = vmatpush3.bf16.msra.mxu0 %v2003_v2  ;;  %v2008_v7 = vld [vmem:[%s2547_s2 + $0x88] sm:$0xff]   ;;  %v2012_v11 = vld [vmem:[%s2547_s2 + $0x90] sm:$0xff]  }
   0x5   :  { %1682 = vmatpush3.bf16.msra.mxu1 %v2004_v3  ;;  %1619 = vmatprep.subr.bf16.mxu0 %v2005_v4  ;;  %v2013_v12 = vld [vmem:[%s2547_s2 + $0x58] sm:$0xff]   ;;  %v2017_v16 = vld [vmem:[%s2547_s2 + $0x60] sm:$0xff]   ;;  %v2021_v20 = vld [vmem:[%s2547_s2 + $0x68] sm:$0xff]  }
   0x6   :  { %1683 = vmatprep.subr.bf16.mxu1 %v2006_v5  ;;  %v2014_v13 = vld [vmem:[%s2547_s2 + $0xd8] sm:$0xff]   ;;  %v2018_v17 = vld [vmem:[%s2547_s2 + $0xe0] sm:$0xff]   ;;  %v2022_v21 = vld [vmem:[%s2547_s2 + $0xe8] sm:$0xff]  }
   0x7   :  { %v2015_v14 = vld [vmem:[%s2547_s2 + $0x18] sm:$0xff]   ;;  %v2019_v18 = vld [vmem:[%s2547_s2 + $0x20] sm:$0xff]   ;;  %v2023_v22 = vld [vmem:[%s2547_s2 + $0x28] sm:$0xff]  }
   0x8   :  { %1620 = vmatpush3.bf16.msra.mxu0 %v2007_v6  ;;  %v2016_v15 = vld [vmem:[%s2547_s2 + $0x98] sm:$0xff]   ;;  %v2020_v19 = vld [vmem:[%s2547_s2 + $0xa0] sm:$0xff]   ;;  %v2024_v23 = vld [vmem:[%s2547_s2 + $0xa8] sm:$0xff]  }
   0x9   :  { %1684 = vmatpush3.bf16.msra.mxu1 %v2008_v7  ;;  %1621 = vmatprep.subr.bf16.mxu0 %v2009_v8  ;;  %v2025_v24 = vld [vmem:[%s2547_s2 + $0x70] sm:$0xff]   ;;  %v2029_v28 = vld [vmem:[%s2547_s2 + $0x78] sm:$0xff]   ;;  %v2345_v0 = vld [vmem:[%s2549_s1] sm:$0xff]  }
   0xa   :  { %1685 = vmatprep.subr.bf16.mxu1 %v2010_v9  ;;  %v2026_v25 = vld [vmem:[%s2547_s2 + $0xf0] sm:$0xff]   ;;  %v2030_v29 = vld [vmem:[%s2547_s2 + $0xf8] sm:$0xff]   ;;  %v2089_v1 = vld [vmem:[%s2550_s4] sm:$0xff]  }
   0xb   :  { %v2027_v26 = vld [vmem:[%s2547_s2 + $0x30] sm:$0xff]   ;;  %v2031_v30 = vld [vmem:[%s2547_s2 + $0x38] sm:$0xff]   ;;  %v2090_v2 = vld [vmem:[%s2550_s4 + $0x8] sm:$0xff]  }
   0xc   :  { %1622 = vmatpush3.bf16.msra.mxu0 %v2011_v10  ;;  %v2028_v27 = vld [vmem:[%s2547_s2 + $0xb0] sm:$0xff]   ;;  %v2032_v31 = vld [vmem:[%s2547_s2 + $0xb8] sm:$0xff]   ;;  %v2093_v5 = vld [vmem:[%s2550_s4 + $0x20] sm:$0xff]  }
   0xd   :  { %1686 = vmatpush3.bf16.msra.mxu1 %v2012_v11  ;;  %1623 = vmatprep.subr.bf16.mxu0 %v2013_v12  ;;  %v2033_v32 = vld [vmem:[%s2548_s0] ss:$16 sps:$4 sm:$0xff]   ;;  %v2035_v33 = vld [vmem:[%s2548_s0 + $0x4] ss:$16 sps:$4 sm:$0xff]   ;;  %v2036_v34 = vld [vmem:[%s2548_s0 + $0x8] ss:$16 sps:$4 sm:$0xff]  }
   0xe   :  { %1687 = vmatprep.subr.bf16.mxu1 %v2014_v13  ;;  %v2038_v35 = vld [vmem:[%s2548_s0 + $0xc] ss:$16 sps:$4 sm:$0xff]   ;;  %526 = vmatprep.mubr.bf16.mxu0 %v2035_v33  ;;  %v2039_v36 = vld [vmem:[%s2548_s0 + $0x24] ss:$16 sps:$4 sm:$0xff]   ;;  %v2043_v38 = vld [vmem:[%s2548_s0 + $0x20] ss:$16 sps:$4 sm:$0xff]  }
   0xf   :  { %623 = vmatprep.mubr.bf16.mxu1 %v2038_v35  ;;  %v2041_v37 = vld [vmem:[%s2548_s0 + $0x2c] ss:$16 sps:$4 sm:$0xff]   ;;  %v2044_v39 = vld [vmem:[%s2548_s0 + $0x28] ss:$16 sps:$4 sm:$0xff]   ;;  %v2045_v40 = vld [vmem:[%s2548_s0 + $0x44] ss:$16 sps:$4 sm:$0xff]  }
  0x10   :  { %1624 = vmatpush3.bf16.msra.mxu0 %v2015_v14  ;;  %v2047_v41 = vld [vmem:[%s2548_s0 + $0x4c] ss:$16 sps:$4 sm:$0xff]   ;;  %v2049_v42 = vld [vmem:[%s2548_s0 + $0x40] ss:$16 sps:$4 sm:$0xff]   ;;  %v2050_v43 = vld [vmem:[%s2548_s0 + $0x48] ss:$16 sps:$4 sm:$0xff]  }
  0x11   :  { %1688 = vmatpush3.bf16.msra.mxu1 %v2016_v15  ;;  %1625 = vmatprep.subr.bf16.mxu0 %v2017_v16  ;;  %v2051_v44 = vld [vmem:[%s2548_s0 + $0x64] ss:$16 sps:$4 sm:$0xff]   ;;  %v2053_v45 = vld [vmem:[%s2548_s0 + $0x6c] ss:$16 sps:$4 sm:$0xff]   ;;  %v2055_v46 = vld [vmem:[%s2548_s0 + $0x60] ss:$16 sps:$4 sm:$0xff]  }
  0x12   :  { %1689 = vmatprep.subr.bf16.mxu1 %v2018_v17  ;;  %v2056_v47 = vld [vmem:[%s2548_s0 + $0x68] ss:$16 sps:$4 sm:$0xff]   ;;  %v2057_v48 = vld [vmem:[%s2548_s0 + $0x84] ss:$16 sps:$4 sm:$0xff]   ;;  %v2059_v49 = vld [vmem:[%s2548_s0 + $0x8c] ss:$16 sps:$4 sm:$0xff]  }
  0x13   :  { %v2061_v50 = vld [vmem:[%s2548_s0 + $0x80] ss:$16 sps:$4 sm:$0xff]   ;;  %v2062_v51 = vld [vmem:[%s2548_s0 + $0x88] ss:$16 sps:$4 sm:$0xff]   ;;  %v2063_v52 = vld [vmem:[%s2548_s0 + $0xa4] ss:$16 sps:$4 sm:$0xff]  }
  0x14   :  { %1626 = vmatpush3.bf16.msra.mxu0 %v2019_v18  ;;  %v2065_v53 = vld [vmem:[%s2548_s0 + $0xac] ss:$16 sps:$4 sm:$0xff]   ;;  %v2067_v54 = vld [vmem:[%s2548_s0 + $0xa0] ss:$16 sps:$4 sm:$0xff]   ;;  %v2068_v55 = vld [vmem:[%s2548_s0 + $0xa8] ss:$16 sps:$4 sm:$0xff]  }
  0x15   :  { %1690 = vmatpush3.bf16.msra.mxu1 %v2020_v19  ;;  %1627 = vmatprep.subr.bf16.mxu0 %v2021_v20  ;;  %v2069_v56 = vld [vmem:[%s2548_s0 + $0xc4] ss:$16 sps:$4 sm:$0xff]   ;;  %v2071_v57 = vld [vmem:[%s2548_s0 + $0xcc] ss:$16 sps:$4 sm:$0xff]   ;;  %v2073_v58 = vld [vmem:[%s2548_s0 + $0xc0] ss:$16 sps:$4 sm:$0xff]  }
  0x16   :  { %1691 = vmatprep.subr.bf16.mxu1 %v2022_v21  ;;  %v2074_v59 = vld [vmem:[%s2548_s0 + $0xc8] ss:$16 sps:$4 sm:$0xff]   ;;  %v2075_v60 = vld [vmem:[%s2548_s0 + $0xe4] ss:$16 sps:$4 sm:$0xff]   ;;  %v2077_v61 = vld [vmem:[%s2548_s0 + $0xec] ss:$16 sps:$4 sm:$0xff]  }
  0x17   :  { %v2079_v62 = vld [vmem:[%s2548_s0 + $0xe0] ss:$16 sps:$4 sm:$0xff]   ;;  %v2080_v63 = vld [vmem:[%s2548_s0 + $0xe8] ss:$16 sps:$4 sm:$0xff]  }
  0x18   :  { %1628 = vmatpush3.bf16.msra.mxu0 %v2023_v22  ;;  %v2091_v3 = vld [vmem:[%s2550_s4 + $0x10] sm:$0xff]   ;;  %v2092_v4 = vld [vmem:[%s2550_s4 + $0x18] sm:$0xff]   ;;  %v2094_v6 = vld [vmem:[%s2550_s4 + $0x28] sm:$0xff]  }
  0x19   :  { %1692 = vmatpush3.bf16.msra.mxu1 %v2024_v23  ;;  %1629 = vmatprep.subr.bf16.mxu0 %v2025_v24 }
  0x1a   :  { %1693 = vmatprep.subr.bf16.mxu1 %v2026_v25 }
  0x1c   :  { %1630 = vmatpush3.bf16.msra.mxu0 %v2027_v26 }
  0x1d   :  { %1694 = vmatpush3.bf16.msra.mxu1 %v2028_v27  ;;  %1631 = vmatprep.subr.bf16.mxu0 %v2029_v28 }
  0x1e   :  { %1695 = vmatprep.subr.bf16.mxu1 %v2030_v29 }
  0x20   :  { %1632 = vmatpush3.bf16.msra.mxu0 %v2031_v30 }
  0x21   :  { %1696 = vmatpush3.bf16.msra.mxu1 %v2032_v31 }
  0x22   :  { %1857 = vmatprep.subr.bf16.mxu1 %v2089_v1 }
  0x23   :  { %527 = vmatmul.mubr.bf16.vlgmr.msra.gmra.mrb[0].mxu0 %v2033_v32 }
  0x24   :  { %624 = vmatmul.mubr.bf16.vlgmr.msra.gmra.mrb[0].mxu1 %v2036_v34  ;;  %534 = vmatprep.mubr.bf16.mxu0 %v2039_v36 }
  0x25   :  { %631 = vmatprep.mubr.bf16.mxu1 %v2041_v37  ;;  %1858 = vmatpush3.bf16.msra.mxu1 %v2089_v1 }
  0x26   :  { %1859 = vmatprep.subr.bf16.mxu1 %v2090_v2 }
  0x29   :  { %1860 = vmatpush3.bf16.msra.mxu1 %v2090_v2 }
  0x2a   :  { %1861 = vmatprep.subr.bf16.mxu1 %v2091_v3 }
  0x2b   :  { %535 = vmatmul.mubr.bf16.gmra.mrb[4].mxu0 %v2043_v38 }
  0x2c   :  { %632 = vmatmul.mubr.bf16.gmra.mrb[4].mxu1 %v2044_v39  ;;  %542 = vmatprep.mubr.bf16.mxu0 %v2045_v40 }
  0x2d   :  { %639 = vmatprep.mubr.bf16.mxu1 %v2047_v41  ;;  %1862 = vmatpush3.bf16.msra.mxu1 %v2091_v3 }
  0x2e   :  { %1863 = vmatprep.subr.bf16.mxu1 %v2092_v4 }
  0x31   :  { %1864 = vmatpush3.bf16.msra.mxu1 %v2092_v4 }
  0x32   :  { %1865 = vmatprep.subr.bf16.mxu1 %v2093_v5 }
  0x33   :  { %543 = vmatmul.mubr.bf16.gmra.mrb[8].mxu0 %v2049_v42 }
  0x34   :  { %640 = vmatmul.mubr.bf16.gmra.mrb[8].mxu1 %v2050_v43  ;;  %550 = vmatprep.mubr.bf16.mxu0 %v2051_v44 }
  0x35   :  { %647 = vmatprep.mubr.bf16.mxu1 %v2053_v45  ;;  %1866 = vmatpush3.bf16.msra.mxu1 %v2093_v5 }
  0x36   :  { %1867 = vmatprep.subr.bf16.mxu1 %v2094_v6 }
  0x39   :  { %1868 = vmatpush3.bf16.msra.mxu1 %v2094_v6 }
  0x3b   :  { %551 = vmatmul.mubr.bf16.gmra.mrb[12].mxu0 %v2055_v46 }
  0x3c   :  { %648 = vmatmul.mubr.bf16.gmra.mrb[12].mxu1 %v2056_v47  ;;  %558 = vmatprep.mubr.bf16.mxu0 %v2057_v48 }
  0x3d   :  { %655 = vmatprep.mubr.bf16.mxu1 %v2059_v49 }
  0x43   :  { %559 = vmatmul.mubr.bf16.gmra.mrb[16].mxu0 %v2061_v50 }
  0x44   :  { %656 = vmatmul.mubr.bf16.gmra.mrb[16].mxu1 %v2062_v51  ;;  %566 = vmatprep.mubr.bf16.mxu0 %v2063_v52 }
  0x45   :  { %663 = vmatprep.mubr.bf16.mxu1 %v2065_v53 }
  0x4b   :  { %567 = vmatmul.mubr.bf16.gmra.mrb[20].mxu0 %v2067_v54 }
  0x4c   :  { %664 = vmatmul.mubr.bf16.gmra.mrb[20].mxu1 %v2068_v55  ;;  %574 = vmatprep.mubr.bf16.mxu0 %v2069_v56 }
  0x4d   :  { %671 = vmatprep.mubr.bf16.mxu1 %v2071_v57 }
  0x53   :  { %575 = vmatmul.mubr.bf16.gmra.mrb[24].mxu0 %v2073_v58 }
  0x54   :  { %672 = vmatmul.mubr.bf16.gmra.mrb[24].mxu1 %v2074_v59  ;;  %582 = vmatprep.mubr.bf16.mxu0 %v2075_v60 }
  0x55   :  { %679 = vmatprep.mubr.bf16.mxu1 %v2077_v61 }
  0x5b   :  { %583 = vmatmul.mubr.bf16.gmra.mrb[28].mxu0 %v2079_v62 }
  0x5c   :  { %680 = vmatmul.mubr.bf16.gmra.mrb[28].mxu1 %v2080_v63  ;;  %1841 = vmatprep.mubr.bf16.mxu0 %v2345_v0 }
  0xf6   :  { %v1633_v7 = vpop.f32.mrb[0].mxu0 }
  0xf7   :  { %v1697_v8 = vpop.f32.mrb[0].mxu1  ;;  %v1634_v9 = vpop.f32.mrb[1].mxu0 }
  0xf8   :  { %v1635_v10 = vadd.f32 %v1634_v9, %v1633_v7  ;;  %v1698_v11 = vpop.f32.mrb[1].mxu1  ;;  %v1636_v12 = vpop.f32.mrb[2].mxu0 }
  0xf9   :  { %v1699_v13 = vadd.f32 %v1698_v11, %v1697_v8  ;;  %v1700_v14 = vpop.f32.mrb[2].mxu1  ;;  %v1637_v15 = vpop.f32.mrb[3].mxu0 }
  0xfa   :  { %v1638_v16 = vadd.f32 %v1637_v15, %v1636_v12  ;;  %v1701_v17 = vpop.f32.mrb[3].mxu1 }
  0xfb   :  { %v626_v18 = vadd.f32 %v1699_v13, %v1635_v10  ;;  %v1702_v19 = vadd.f32 %v1701_v17, %v1700_v14 }
  0xfd   :  { %v629_v20 = vadd.f32 %v1702_v19, %v1638_v16 }
  0xfe   :  { %v1639_v21 = vpop.f32.mrb[4].mxu0 }
  0xff   :  { %v1703_v22 = vpop.f32.mrb[4].mxu1  ;;  %v1640_v23 = vpop.f32.mrb[5].mxu0  ;;  %v688_v24 = vpack.c.bf16 %v629_v20, %v626_v18 }
 0x100   :  { %v1641_v25 = vadd.f32 %v1640_v23, %v1639_v21  ;;  %v1704_v26 = vpop.f32.mrb[5].mxu1  ;;  %v1642_v27 = vpop.f32.mrb[6].mxu0 }
 0x101   :  { %v1705_v28 = vadd.f32 %v1704_v26, %v1703_v22  ;;  %v1706_v29 = vpop.f32.mrb[6].mxu1  ;;  %1825 = vmatprep.subr.bf16.mxu0 %v688_v24  ;;  %v1643_v30 = vpop.f32.mrb[7].mxu0 }
 0x102   :  { %v1644_v31 = vadd.f32 %v1643_v30, %v1642_v27  ;;  %v1707_v32 = vpop.f32.mrb[7].mxu1  ;;  %1826 = vmatpush3.bf16.msra.mxu0 %v688_v24 }
 0x103   :  { %v634_v33 = vadd.f32 %v1705_v28, %v1641_v25  ;;  %v1708_v34 = vadd.f32 %v1707_v32, %v1706_v29 }
 0x105   :  { %v637_v35 = vadd.f32 %v1708_v34, %v1644_v31 }
 0x106   :  { %v1645_v36 = vpop.f32.mrb[8].mxu0 }
 0x107   :  { %v1709_v37 = vpop.f32.mrb[8].mxu1  ;;  %v1646_v38 = vpop.f32.mrb[9].mxu0  ;;  %v689_v39 = vpack.c.bf16 %v637_v35, %v634_v33 }
 0x108   :  { %v1647_v40 = vadd.f32 %v1646_v38, %v1645_v36  ;;  %v1710_v41 = vpop.f32.mrb[9].mxu1  ;;  %v1648_v42 = vpop.f32.mrb[10].mxu0 }
 0x109   :  { %v1711_v43 = vadd.f32 %v1710_v41, %v1709_v37  ;;  %v1712_v44 = vpop.f32.mrb[10].mxu1  ;;  %1827 = vmatprep.subr.bf16.mxu0 %v689_v39  ;;  %v1649_v45 = vpop.f32.mrb[11].mxu0 }
 0x10a   :  { %v1650_v46 = vadd.f32 %v1649_v45, %v1648_v42  ;;  %v1713_v47 = vpop.f32.mrb[11].mxu1  ;;  %1828 = vmatpush3.bf16.msra.mxu0 %v689_v39 }
 0x10b   :  { %v642_v48 = vadd.f32 %v1711_v43, %v1647_v40  ;;  %v1714_v49 = vadd.f32 %v1713_v47, %v1712_v44 }
 0x10d   :  { %v645_v50 = vadd.f32 %v1714_v49, %v1650_v46 }
 0x10e   :  { %v1651_v51 = vpop.f32.mrb[12].mxu0 }
 0x10f   :  { %v1715_v52 = vpop.f32.mrb[12].mxu1  ;;  %v1652_v53 = vpop.f32.mrb[13].mxu0  ;;  %v690_v54 = vpack.c.bf16 %v645_v50, %v642_v48 }
 0x110   :  { %v1653_v55 = vadd.f32 %v1652_v53, %v1651_v51  ;;  %v1716_v56 = vpop.f32.mrb[13].mxu1  ;;  %v1654_v57 = vpop.f32.mrb[14].mxu0 }
 0x111   :  { %v1717_v58 = vadd.f32 %v1716_v56, %v1715_v52  ;;  %v1718_v59 = vpop.f32.mrb[14].mxu1  ;;  %1829 = vmatprep.subr.bf16.mxu0 %v690_v54  ;;  %v1655_v60 = vpop.f32.mrb[15].mxu0 }
 0x112   :  { %v1656_v61 = vadd.f32 %v1655_v60, %v1654_v57  ;;  %v1719_v62 = vpop.f32.mrb[15].mxu1  ;;  %1830 = vmatpush3.bf16.msra.mxu0 %v690_v54 }
 0x113   :  { %v650_v63 = vadd.f32 %v1717_v58, %v1653_v55  ;;  %v1720_v1 = vadd.f32 %v1719_v62, %v1718_v59 }
 0x115   :  { %v653_v2 = vadd.f32 %v1720_v1, %v1656_v61  ;;  %v2369_v1 = vld [vmem:[%s2549_s1 + $0x8] sm:$0xff]  }
 0x116   :  { %v1657_v3 = vpop.f32.mrb[16].mxu0 }
 0x117   :  { %v1721_v4 = vpop.f32.mrb[16].mxu1  ;;  %v1658_v5 = vpop.f32.mrb[17].mxu0  ;;  %v691_v6 = vpack.c.bf16 %v653_v2, %v650_v63  ;;  %v2374_v2 = vld [vmem:[%s2549_s1 + $0x10] sm:$0xff]  }
 0x118   :  { %v1659_v7 = vadd.f32 %v1658_v5, %v1657_v3  ;;  %v1722_v8 = vpop.f32.mrb[17].mxu1  ;;  %v1660_v9 = vpop.f32.mrb[18].mxu0  ;;  %v2381_v3 = vld [vmem:[%s2549_s1 + $0x18] sm:$0xff]   ;;  %v2393_v5 = vld [vmem:[%s2549_s1 + $0x28] sm:$0xff]  }
 0x119   :  { %v1723_v10 = vadd.f32 %v1722_v8, %v1721_v4  ;;  %v1724_v11 = vpop.f32.mrb[18].mxu1  ;;  %1831 = vmatprep.subr.bf16.mxu0 %v691_v6  ;;  %v1661_v12 = vpop.f32.mrb[19].mxu0  ;;  %v2386_v4 = vld [vmem:[%s2549_s1 + $0x20] sm:$0xff]   ;;  %v2095_v8 = vld [vmem:[%s2550_s4 + $0x30] sm:$0xff]  }
 0x11a   :  { %v1662_v13 = vadd.f32 %v1661_v12, %v1660_v9  ;;  %v1725_v14 = vpop.f32.mrb[19].mxu1  ;;  %1832 = vmatpush3.bf16.msra.mxu0 %v691_v6  ;;  %v2398_v6 = vld [vmem:[%s2549_s1 + $0x30] sm:$0xff]   ;;  %1869 = vmatprep.subr.bf16.mxu1 %v2095_v8  ;;  %v2096_v9 = vld [vmem:[%s2550_s4 + $0x38] sm:$0xff]  }
 0x11b   :  { %v658_v15 = vadd.f32 %v1723_v10, %v1659_v7  ;;  %v1726_v16 = vadd.f32 %v1725_v14, %v1724_v11  ;;  %v2405_v7 = vld [vmem:[%s2549_s1 + $0x38] sm:$0xff]   ;;  %1870 = vmatpush3.bf16.msra.mxu1 %v2095_v8  ;;  %v2418_v10 = vld [vmem:[%s2551_s3] ss:$0 sm:$0xff] }
 0x11c   :  { %1871 = vmatprep.subr.bf16.mxu1 %v2096_v9 }
 0x11d   :  { %v661_v17 = vadd.f32 %v1726_v16, %v1662_v13 }
 0x11e   :  { %v1663_v18 = vpop.f32.mrb[20].mxu0 }
 0x11f   :  { %v1727_v19 = vpop.f32.mrb[20].mxu1  ;;  %v1664_v20 = vpop.f32.mrb[21].mxu0  ;;  %v692_v21 = vpack.c.bf16 %v661_v17, %v658_v15  ;;  %1872 = vmatpush3.bf16.msra.mxu1 %v2096_v9 }
 0x120   :  { %v1665_v22 = vadd.f32 %v1664_v20, %v1663_v18  ;;  %v1728_v23 = vpop.f32.mrb[21].mxu1  ;;  %v1666_v24 = vpop.f32.mrb[22].mxu0 }
 0x121   :  { %v1729_v25 = vadd.f32 %v1728_v23, %v1727_v19  ;;  %v1730_v26 = vpop.f32.mrb[22].mxu1  ;;  %1833 = vmatprep.subr.bf16.mxu0 %v692_v21  ;;  %v1667_v27 = vpop.f32.mrb[23].mxu0 }
 0x122   :  { %v1668_v28 = vadd.f32 %v1667_v27, %v1666_v24  ;;  %v1731_v29 = vpop.f32.mrb[23].mxu1  ;;  %1834 = vmatpush3.bf16.msra.mxu0 %v692_v21 }
 0x123   :  { %v666_v30 = vadd.f32 %v1729_v25, %v1665_v22  ;;  %v1732_v31 = vadd.f32 %v1731_v29, %v1730_v26 }
 0x125   :  { %v669_v32 = vadd.f32 %v1732_v31, %v1668_v28 }
 0x126   :  { %v1669_v33 = vpop.f32.mrb[24].mxu0 }
 0x127   :  { %v1733_v34 = vpop.f32.mrb[24].mxu1  ;;  %v1670_v35 = vpop.f32.mrb[25].mxu0  ;;  %v693_v36 = vpack.c.bf16 %v669_v32, %v666_v30 }
 0x128   :  { %v1671_v37 = vadd.f32 %v1670_v35, %v1669_v33  ;;  %v1734_v38 = vpop.f32.mrb[25].mxu1  ;;  %v1672_v39 = vpop.f32.mrb[26].mxu0 }
 0x129   :  { %v1735_v40 = vadd.f32 %v1734_v38, %v1733_v34  ;;  %v1736_v41 = vpop.f32.mrb[26].mxu1  ;;  %1835 = vmatprep.subr.bf16.mxu0 %v693_v36  ;;  %v1673_v42 = vpop.f32.mrb[27].mxu0 }
 0x12a   :  { %v1674_v43 = vadd.f32 %v1673_v42, %v1672_v39  ;;  %v1737_v44 = vpop.f32.mrb[27].mxu1  ;;  %1836 = vmatpush3.bf16.msra.mxu0 %v693_v36 }
 0x12b   :  { %v674_v45 = vadd.f32 %v1735_v40, %v1671_v37  ;;  %v1738_v46 = vadd.f32 %v1737_v44, %v1736_v41 }
 0x12d   :  { %v677_v47 = vadd.f32 %v1738_v46, %v1674_v43 }
 0x12e   :  { %v1675_v48 = vpop.f32.mrb[28].mxu0 }
 0x12f   :  { %v1739_v49 = vpop.f32.mrb[28].mxu1  ;;  %v1676_v50 = vpop.f32.mrb[29].mxu0  ;;  %v694_v51 = vpack.c.bf16 %v677_v47, %v674_v45 }
 0x130   :  { %v1677_v52 = vadd.f32 %v1676_v50, %v1675_v48  ;;  %v1740_v53 = vpop.f32.mrb[29].mxu1  ;;  %v1678_v54 = vpop.f32.mrb[30].mxu0 }
 0x131   :  { %v1741_v55 = vadd.f32 %v1740_v53, %v1739_v49  ;;  %v1742_v56 = vpop.f32.mrb[30].mxu1  ;;  %1837 = vmatprep.subr.bf16.mxu0 %v694_v51  ;;  %v1679_v57 = vpop.f32.mrb[31].mxu0 }
 0x132   :  { %v1680_v58 = vadd.f32 %v1679_v57, %v1678_v54  ;;  %v1743_v59 = vpop.f32.mrb[31].mxu1  ;;  %1838 = vmatpush3.bf16.msra.mxu0 %v694_v51 }
 0x133   :  { %v682_v60 = vadd.f32 %v1741_v55, %v1677_v52  ;;  %v1744_v61 = vadd.f32 %v1743_v59, %v1742_v56 }
 0x135   :  { %v685_v62 = vadd.f32 %v1744_v61, %v1680_v58 }
 0x137   :  { %v695_v63 = vpack.c.bf16 %v685_v62, %v682_v60 }
 0x139   :  { %1839 = vmatprep.subr.bf16.mxu0 %v695_v63 }
 0x13a   :  { %1840 = vmatpush3.bf16.msra.mxu0 %v695_v63 }
 0x13d   :  { %1842 = vmatmul.mubr.bf16.vlgmr.msra.gmra.mrb[32].mxu0 %v2369_v1 }
 0x13e   :  { %1845 = vmatprep.mubr.bf16.mxu0 %v2374_v2 }
 0x145   :  { %1846 = vmatmul.mubr.bf16.gmra.mrb[36].mxu0 %v2381_v3 }
 0x146   :  { %1849 = vmatprep.mubr.bf16.mxu0 %v2386_v4 }
 0x14d   :  { %1850 = vmatmul.mubr.bf16.gmra.mrb[40].mxu0 %v2393_v5 }
 0x14e   :  { %1853 = vmatprep.mubr.bf16.mxu0 %v2398_v6 }
 0x155   :  { %1854 = vmatmul.mubr.bf16.gmra.mrb[44].mxu0 %v2405_v7 }
 0x156   :  { %1905 = vmatprep.mubr.bf16.mxu0 %v2345_v0 }
 0x210   :  { %v1843_v11 = vpop.f32.mrb[32].mxu0 }
 0x211   :  { %v794_v12 = vadd.f32 %v1843_v11, %v2418_v10  ;;  %v785_v13 = vpop.f32.mrb[33].mxu0 }
 0x212   :  { %v786_v14 = vadd.f32 %v2418_v10, %v785_v13  ;;  %v1844_v15 = vpop.f32.mrb[34].mxu0 }
 0x213   :  { %v866_v16 = vmul.f32 0.2, %v794_v12  ;;  %v797_v17 = vadd.f32 %v1844_v15, %v2418_v10  ;;  %v788_v18 = vpop.f32.mrb[35].mxu0  ;;  %vm850_vm0 = vcmp.gt.f32.partialorder %v794_v12, 0.0 }
 0x214   :  { %v864_v19 = vmul.f32 0.2, %v786_v14  ;;  %v789_v20 = vadd.f32 %v2418_v10, %v788_v18  ;;  %vm848_vm1 = vcmp.gt.f32.partialorder %v786_v14, 0.0 }
 0x215   :  { %vm851_vm2 = vcmp.gt.f32.partialorder %v797_v17, 0.0  ;;  %v867_v21 = vmul.f32 0.2, %v797_v17  ;;  %v882_v23 = vsel %vm850_vm0, %v794_v12, %v866_v16 }
 0x216   :  { %vm849_vm3 = vcmp.gt.f32.partialorder %v789_v20, 0.0  ;;  %v865_v22 = vmul.f32 0.2, %v789_v20  ;;  %v880_v27 = vsel %vm848_vm1, %v786_v14, %v864_v19 }
 0x217   :  { %v883_v24 = vsel %vm851_vm2, %v797_v17, %v867_v21 }
 0x218   :  { %v897_v25 = vpack.c.bf16 %v883_v24, %v882_v23  ;;  %v1847_v26 = vpop.f32.mrb[36].mxu0  ;;  %v881_v28 = vsel %vm849_vm3, %v789_v20, %v865_v22 }
 0x219   :  { %v810_v29 = vadd.f32 %v1847_v26, %v2418_v10  ;;  %v801_v30 = vpop.f32.mrb[37].mxu0  ;;  %v896_v31 = vpack.c.bf16 %v881_v28, %v880_v27  ;;  %v2097_v28 = vld [vmem:[%s2552_s6] sm:$0xff]  }
 0x21a   :  { %v802_v32 = vadd.f32 %v2418_v10, %v801_v30  ;;  %v1848_v33 = vpop.f32.mrb[38].mxu0  ;;  %1921 = vmatprep.subr.bf16.mxu1 %v2097_v28  ;;  %v2100_v30 = vld [vmem:[%s2552_s6 + $0x18] sm:$0xff]  }
 0x21b   :  { %v870_v34 = vmul.f32 0.2, %v810_v29  ;;  %v813_v35 = vadd.f32 %v1848_v33, %v2418_v10  ;;  %v804_v36 = vpop.f32.mrb[39].mxu0  ;;  %1873 = vmatprep.mubr.bf16.mxu1 %v896_v31  ;;  %vm854_vm4 = vcmp.gt.f32.partialorder %v810_v29, 0.0  ;;  %v2101_v31 = vld [vmem:[%s2552_s6 + $0x20] sm:$0xff]  }
 0x21c   :  { %v868_v37 = vmul.f32 0.2, %v802_v32  ;;  %v805_v38 = vadd.f32 %v2418_v10, %v804_v36  ;;  %1874 = vmatmul.mubr.bf16.vlgmr.msra.gmra.mrb[32].mxu1 %v897_v25  ;;  %vm852_vm5 = vcmp.gt.f32.partialorder %v802_v32, 0.0 }
 0x21d   :  { %vm855_vm6 = vcmp.gt.f32.partialorder %v813_v35, 0.0  ;;  %v871_v39 = vmul.f32 0.2, %v813_v35  ;;  %v886_v41 = vsel %vm854_vm4, %v810_v29, %v870_v34  ;;  %1922 = vmatpush3.bf16.msra.mxu1 %v2097_v28  ;;  %v2099_v29 = vld [vmem:[%s2552_s6 + $0x10] sm:$0xff]  }
 0x21e   :  { %vm853_vm7 = vcmp.gt.f32.partialorder %v805_v38, 0.0  ;;  %v869_v40 = vmul.f32 0.2, %v805_v38  ;;  %v884_v44 = vsel %vm852_vm5, %v802_v32, %v868_v37 }
 0x21f   :  { %v887_v42 = vsel %vm855_vm6, %v813_v35, %v871_v39 }
 0x220   :  { %v1851_v43 = vpop.f32.mrb[40].mxu0  ;;  %v885_v45 = vsel %vm853_vm7, %v805_v38, %v869_v40  ;;  %v899_v46 = vpack.c.bf16 %v887_v42, %v886_v41 }
 0x221   :  { %v826_v47 = vadd.f32 %v1851_v43, %v2418_v10  ;;  %v817_v48 = vpop.f32.mrb[41].mxu0  ;;  %v898_v49 = vpack.c.bf16 %v885_v45, %v884_v44 }
 0x222   :  { %v818_v50 = vadd.f32 %v2418_v10, %v817_v48  ;;  %v1852_v51 = vpop.f32.mrb[42].mxu0 }
 0x223   :  { %v874_v52 = vmul.f32 0.2, %v826_v47  ;;  %v829_v53 = vadd.f32 %v1852_v51, %v2418_v10  ;;  %v820_v54 = vpop.f32.mrb[43].mxu0  ;;  %1877 = vmatprep.mubr.bf16.mxu1 %v898_v49  ;;  %vm858_vm8 = vcmp.gt.f32.partialorder %v826_v47, 0.0 }
 0x224   :  { %v872_v55 = vmul.f32 0.2, %v818_v50  ;;  %v821_v56 = vadd.f32 %v2418_v10, %v820_v54  ;;  %1878 = vmatmul.mubr.bf16.gmra.mrb[36].mxu1 %v899_v46  ;;  %vm856_vm9 = vcmp.gt.f32.partialorder %v818_v50, 0.0 }
 0x225   :  { %vm859_vm10 = vcmp.gt.f32.partialorder %v829_v53, 0.0  ;;  %v875_v57 = vmul.f32 0.2, %v829_v53  ;;  %v890_v59 = vsel %vm858_vm8, %v826_v47, %v874_v52 }
 0x226   :  { %vm857_vm11 = vcmp.gt.f32.partialorder %v821_v56, 0.0  ;;  %v873_v58 = vmul.f32 0.2, %v821_v56  ;;  %v888_v62 = vsel %vm856_vm9, %v818_v50, %v872_v55 }
 0x227   :  { %v891_v60 = vsel %vm859_vm10, %v829_v53, %v875_v57  ;;  %v2103_v57 = vld [vmem:[%s2552_s6 + $0x30] sm:$0xff]  }
 0x228   :  { %v1855_v61 = vpop.f32.mrb[44].mxu0  ;;  %v889_v63 = vsel %vm857_vm11, %v821_v56, %v873_v58  ;;  %v901_v8 = vpack.c.bf16 %v891_v60, %v890_v59  ;;  %v2102_v56 = vld [vmem:[%s2552_s6 + $0x28] sm:$0xff]   ;;  %v2104_v58 = vld [vmem:[%s2552_s6 + $0x38] sm:$0xff]  }
 0x229   :  { %v842_v9 = vadd.f32 %v1855_v61, %v2418_v10  ;;  %v833_v11 = vpop.f32.mrb[45].mxu0  ;;  %v900_v12 = vpack.c.bf16 %v889_v63, %v888_v62 }
 0x22a   :  { %v834_v13 = vadd.f32 %v2418_v10, %v833_v11  ;;  %v1856_v14 = vpop.f32.mrb[46].mxu0 }
 0x22b   :  { %v878_v15 = vmul.f32 0.2, %v842_v9  ;;  %v845_v16 = vadd.f32 %v1856_v14, %v2418_v10  ;;  %v836_v17 = vpop.f32.mrb[47].mxu0  ;;  %1881 = vmatprep.mubr.bf16.mxu1 %v900_v12  ;;  %vm862_vm12 = vcmp.gt.f32.partialorder %v842_v9, 0.0 }
 0x22c   :  { %v876_v18 = vmul.f32 0.2, %v834_v13  ;;  %v837_v19 = vadd.f32 %v2418_v10, %v836_v17  ;;  %1882 = vmatmul.mubr.bf16.gmra.mrb[40].mxu1 %v901_v8  ;;  %vm860_vm13 = vcmp.gt.f32.partialorder %v834_v13, 0.0  ;;  %v2098_v10 = vld [vmem:[%s2552_s6 + $0x8] sm:$0xff]  }
 0x22d   :  { %vm863_vm14 = vcmp.gt.f32.partialorder %v845_v16, 0.0  ;;  %v879_v20 = vmul.f32 0.2, %v845_v16  ;;  %v894_v22 = vsel %vm862_vm12, %v842_v9, %v878_v15  ;;  %1923 = vmatprep.subr.bf16.mxu1 %v2098_v10 }
 0x22e   :  { %vm861_vm15 = vcmp.gt.f32.partialorder %v837_v19, 0.0  ;;  %v877_v21 = vmul.f32 0.2, %v837_v19  ;;  %v892_v24 = vsel %vm860_vm13, %v834_v13, %v876_v18  ;;  %1924 = vmatpush3.bf16.msra.mxu1 %v2098_v10 }
 0x22f   :  { %v895_v23 = vsel %vm863_vm14, %v845_v16, %v879_v20  ;;  %1925 = vmatprep.subr.bf16.mxu1 %v2099_v29 }
 0x230   :  { %v893_v25 = vsel %vm861_vm15, %v837_v19, %v877_v21  ;;  %v903_v26 = vpack.c.bf16 %v895_v23, %v894_v22 }
 0x231   :  { %v902_v27 = vpack.c.bf16 %v893_v25, %v892_v24 }
 0x232   :  { %1926 = vmatpush3.bf16.msra.mxu1 %v2099_v29 }
 0x233   :  { %1885 = vmatprep.mubr.bf16.mxu1 %v902_v27  ;;  %1927 = vmatprep.subr.bf16.mxu1 %v2100_v30 }
 0x234   :  { %1886 = vmatmul.mubr.bf16.gmra.mrb[44].mxu1 %v903_v26 }
 0x236   :  { %1928 = vmatpush3.bf16.msra.mxu1 %v2100_v30 }
 0x237   :  { %1929 = vmatprep.subr.bf16.mxu1 %v2101_v31 }
 0x23a   :  { %1930 = vmatpush3.bf16.msra.mxu1 %v2101_v31 }
 0x23b   :  { %1931 = vmatprep.subr.bf16.mxu1 %v2102_v56 }
 0x23e   :  { %1932 = vmatpush3.bf16.msra.mxu1 %v2102_v56 }
 0x23f   :  { %1933 = vmatprep.subr.bf16.mxu1 %v2103_v57 }
 0x242   :  { %1934 = vmatpush3.bf16.msra.mxu1 %v2103_v57 }
 0x243   :  { %1935 = vmatprep.subr.bf16.mxu1 %v2104_v58 }
 0x246   :  { %1936 = vmatpush3.bf16.msra.mxu1 %v2104_v58 }
 0x2ef   :  { %v1875_v32 = vpop.f32.mrb[32].mxu1 }
 0x2f0   :  { %v1002_v33 = vpop.f32.mrb[33].mxu1 }
 0x2f1   :  { %v1876_v34 = vpop.f32.mrb[34].mxu1 }
 0x2f2   :  { %v1066_v35 = vpack.c.bf16 %v1876_v34, %v1875_v32  ;;  %v1005_v36 = vpop.f32.mrb[35].mxu1 }
 0x2f3   :  { %v1065_v37 = vpack.c.bf16 %v1005_v36, %v1002_v33 }
 0x2f5   :  { %1889 = vmatprep.subr.bf16.mxu0 %v1065_v37 }
 0x2f6   :  { %1890 = vmatpush3.bf16.msra.mxu0 %v1065_v37 }
 0x2f7   :  { %v1879_v38 = vpop.f32.mrb[36].mxu1  ;;  %1891 = vmatprep.subr.bf16.mxu0 %v1066_v35 }
 0x2f8   :  { %v1018_v39 = vpop.f32.mrb[37].mxu1 }
 0x2f9   :  { %v1880_v40 = vpop.f32.mrb[38].mxu1 }
 0x2fa   :  { %v1068_v41 = vpack.c.bf16 %v1880_v40, %v1879_v38  ;;  %v1021_v42 = vpop.f32.mrb[39].mxu1  ;;  %1892 = vmatpush3.bf16.msra.mxu0 %v1066_v35 }
 0x2fb   :  { %v1067_v43 = vpack.c.bf16 %v1021_v42, %v1018_v39 }
 0x2fd   :  { %1893 = vmatprep.subr.bf16.mxu0 %v1067_v43 }
 0x2fe   :  { %1894 = vmatpush3.bf16.msra.mxu0 %v1067_v43 }
 0x2ff   :  { %v1883_v44 = vpop.f32.mrb[40].mxu1  ;;  %1895 = vmatprep.subr.bf16.mxu0 %v1068_v41 }
 0x300   :  { %v1034_v45 = vpop.f32.mrb[41].mxu1 }
 0x301   :  { %v1884_v46 = vpop.f32.mrb[42].mxu1 }
 0x302   :  { %v1070_v47 = vpack.c.bf16 %v1884_v46, %v1883_v44  ;;  %v1037_v48 = vpop.f32.mrb[43].mxu1  ;;  %1896 = vmatpush3.bf16.msra.mxu0 %v1068_v41 }
 0x303   :  { %v1069_v49 = vpack.c.bf16 %v1037_v48, %v1034_v45 }
 0x305   :  { %1897 = vmatprep.subr.bf16.mxu0 %v1069_v49 }
 0x306   :  { %1898 = vmatpush3.bf16.msra.mxu0 %v1069_v49 }
 0x307   :  { %v1887_v50 = vpop.f32.mrb[44].mxu1  ;;  %1899 = vmatprep.subr.bf16.mxu0 %v1070_v47 }
 0x308   :  { %v1050_v51 = vpop.f32.mrb[45].mxu1 }
 0x309   :  { %v1888_v52 = vpop.f32.mrb[46].mxu1 }
 0x30a   :  { %v1072_v53 = vpack.c.bf16 %v1888_v52, %v1887_v50  ;;  %v1053_v54 = vpop.f32.mrb[47].mxu1  ;;  %1900 = vmatpush3.bf16.msra.mxu0 %v1070_v47 }
 0x30b   :  { %v1071_v55 = vpack.c.bf16 %v1053_v54, %v1050_v51 }
 0x30d   :  { %1901 = vmatprep.subr.bf16.mxu0 %v1071_v55 }
 0x30e   :  { %1902 = vmatpush3.bf16.msra.mxu0 %v1071_v55 }
 0x30f   :  { %1903 = vmatprep.subr.bf16.mxu0 %v1072_v53 }
 0x312   :  { %1904 = vmatpush3.bf16.msra.mxu0 %v1072_v53 }
 0x315   :  { %1906 = vmatmul.mubr.bf16.vlgmr.msra.gmra.mrb[48].mxu0 %v2369_v1 }
 0x316   :  { %1909 = vmatprep.mubr.bf16.mxu0 %v2374_v2 }
 0x31d   :  { %1910 = vmatmul.mubr.bf16.gmra.mrb[52].mxu0 %v2381_v3 }
 0x31e   :  { %1913 = vmatprep.mubr.bf16.mxu0 %v2386_v4 }
 0x325   :  { %1914 = vmatmul.mubr.bf16.gmra.mrb[56].mxu0 %v2393_v5 }
 0x326   :  { %1917 = vmatprep.mubr.bf16.mxu0 %v2398_v6 }
 0x32d   :  { %1918 = vmatmul.mubr.bf16.gmra.mrb[60].mxu0 %v2405_v7 }
 0x32e   :  { %1969 = vmatprep.mubr.bf16.mxu0 %v2345_v0  ;;  %v2471_v0 = vld [vmem:[%s2553_s5] ss:$0 sm:$0xff] }
 0x3e8   :  { %v1907_v59 = vpop.f32.mrb[48].mxu0 }
 0x3e9   :  { %v1123_v60 = vadd.f32 %v1907_v59, %v2471_v0  ;;  %v1114_v61 = vpop.f32.mrb[49].mxu0 }
 0x3ea   :  { %v1115_v62 = vadd.f32 %v2471_v0, %v1114_v61  ;;  %v1908_v63 = vpop.f32.mrb[50].mxu0 }
 0x3eb   :  { %v1195_v8 = vmul.f32 0.2, %v1123_v60  ;;  %v1126_v9 = vadd.f32 %v1908_v63, %v2471_v0  ;;  %v1117_v11 = vpop.f32.mrb[51].mxu0  ;;  %vm1179_vm0 = vcmp.gt.f32.partialorder %v1123_v60, 0.0 }
 0x3ec   :  { %v1193_v12 = vmul.f32 0.2, %v1115_v62  ;;  %v1118_v13 = vadd.f32 %v2471_v0, %v1117_v11  ;;  %vm1177_vm1 = vcmp.gt.f32.partialorder %v1115_v62, 0.0 }
 0x3ed   :  { %vm1180_vm2 = vcmp.gt.f32.partialorder %v1126_v9, 0.0  ;;  %v1196_v14 = vmul.f32 0.2, %v1126_v9  ;;  %v1211_v16 = vsel %vm1179_vm0, %v1123_v60, %v1195_v8 }
 0x3ee   :  { %vm1178_vm3 = vcmp.gt.f32.partialorder %v1118_v13, 0.0  ;;  %v1194_v15 = vmul.f32 0.2, %v1118_v13  ;;  %v1209_v20 = vsel %vm1177_vm1, %v1115_v62, %v1193_v12 }
 0x3ef   :  { %v1212_v17 = vsel %vm1180_vm2, %v1126_v9, %v1196_v14 }
 0x3f0   :  { %v1226_v18 = vpack.c.bf16 %v1212_v17, %v1211_v16  ;;  %v1911_v19 = vpop.f32.mrb[52].mxu0  ;;  %v1210_v21 = vsel %vm1178_vm3, %v1118_v13, %v1194_v15 }
 0x3f1   :  { %v1139_v22 = vadd.f32 %v1911_v19, %v2471_v0  ;;  %v1130_v23 = vpop.f32.mrb[53].mxu0  ;;  %v1225_v24 = vpack.c.bf16 %v1210_v21, %v1209_v20 }
 0x3f2   :  { %v1131_v25 = vadd.f32 %v2471_v0, %v1130_v23  ;;  %v1912_v26 = vpop.f32.mrb[54].mxu0 }
 0x3f3   :  { %v1199_v27 = vmul.f32 0.2, %v1139_v22  ;;  %v1142_v28 = vadd.f32 %v1912_v26, %v2471_v0  ;;  %v1133_v10 = vpop.f32.mrb[55].mxu0  ;;  %1937 = vmatprep.mubr.bf16.mxu1 %v1225_v24  ;;  %vm1183_vm4 = vcmp.gt.f32.partialorder %v1139_v22, 0.0 }
 0x3f4   :  { %v1197_v29 = vmul.f32 0.2, %v1131_v25  ;;  %v1134_v30 = vadd.f32 %v2471_v0, %v1133_v10  ;;  %1938 = vmatmul.mubr.bf16.vlgmr.msra.gmra.mrb[48].mxu1 %v1226_v18  ;;  %vm1181_vm5 = vcmp.gt.f32.partialorder %v1131_v25, 0.0 }
 0x3f5   :  { %vm1184_vm6 = vcmp.gt.f32.partialorder %v1142_v28, 0.0  ;;  %v1200_v31 = vmul.f32 0.2, %v1142_v28  ;;  %v1215_v33 = vsel %vm1183_vm4, %v1139_v22, %v1199_v27 }
 0x3f6   :  { %vm1182_vm7 = vcmp.gt.f32.partialorder %v1134_v30, 0.0  ;;  %v1198_v32 = vmul.f32 0.2, %v1134_v30  ;;  %v1213_v36 = vsel %vm1181_vm5, %v1131_v25, %v1197_v29 }
 0x3f7   :  { %v1216_v34 = vsel %vm1184_vm6, %v1142_v28, %v1200_v31 }
 0x3f8   :  { %v1915_v35 = vpop.f32.mrb[56].mxu0  ;;  %v1214_v37 = vsel %vm1182_vm7, %v1134_v30, %v1198_v32  ;;  %v1228_v38 = vpack.c.bf16 %v1216_v34, %v1215_v33 }
 0x3f9   :  { %v1155_v39 = vadd.f32 %v1915_v35, %v2471_v0  ;;  %v1146_v40 = vpop.f32.mrb[57].mxu0  ;;  %v1227_v41 = vpack.c.bf16 %v1214_v37, %v1213_v36 }
 0x3fa   :  { %v1147_v42 = vadd.f32 %v2471_v0, %v1146_v40  ;;  %v1916_v43 = vpop.f32.mrb[58].mxu0 }
 0x3fb   :  { %v1203_v44 = vmul.f32 0.2, %v1155_v39  ;;  %v1158_v45 = vadd.f32 %v1916_v43, %v2471_v0  ;;  %v1149_v46 = vpop.f32.mrb[59].mxu0  ;;  %1941 = vmatprep.mubr.bf16.mxu1 %v1227_v41  ;;  %vm1187_vm8 = vcmp.gt.f32.partialorder %v1155_v39, 0.0  ;;  %v1616_v41 = vld [vmem:[%s2554_s7] ss:$0 sm:$0xff] }
 0x3fc   :  { %v1201_v47 = vmul.f32 0.2, %v1147_v42  ;;  %v1150_v48 = vadd.f32 %v2471_v0, %v1149_v46  ;;  %1942 = vmatmul.mubr.bf16.gmra.mrb[52].mxu1 %v1228_v38  ;;  %vm1185_vm9 = vcmp.gt.f32.partialorder %v1147_v42, 0.0 }
 0x3fd   :  { %vm1188_vm10 = vcmp.gt.f32.partialorder %v1158_v45, 0.0  ;;  %v1204_v49 = vmul.f32 0.2, %v1158_v45  ;;  %v1219_v51 = vsel %vm1187_vm8, %v1155_v39, %v1203_v44 }
 0x3fe   :  { %vm1186_vm11 = vcmp.gt.f32.partialorder %v1150_v48, 0.0  ;;  %v1202_v50 = vmul.f32 0.2, %v1150_v48  ;;  %v1217_v54 = vsel %vm1185_vm9, %v1147_v42, %v1201_v47 }
 0x3ff   :  { %v1220_v52 = vsel %vm1188_vm10, %v1158_v45, %v1204_v49 }
 0x400   :  { %v1919_v53 = vpop.f32.mrb[60].mxu0  ;;  %v1218_v55 = vsel %vm1186_vm11, %v1150_v48, %v1202_v50  ;;  %v1230_v56 = vpack.c.bf16 %v1220_v52, %v1219_v51 }
 0x401   :  { %v1171_v57 = vadd.f32 %v1919_v53, %v2471_v0  ;;  %v1162_v58 = vpop.f32.mrb[61].mxu0  ;;  %v1229_v59 = vpack.c.bf16 %v1218_v55, %v1217_v54 }
 0x402   :  { %v1163_v60 = vadd.f32 %v2471_v0, %v1162_v58  ;;  %v1920_v61 = vpop.f32.mrb[62].mxu0 }
 0x403   :  { %v1207_v62 = vmul.f32 0.2, %v1171_v57  ;;  %v1174_v63 = vadd.f32 %v1920_v61, %v2471_v0  ;;  %v1165_v8 = vpop.f32.mrb[63].mxu0  ;;  %1945 = vmatprep.mubr.bf16.mxu1 %v1229_v59  ;;  %vm1191_vm12 = vcmp.gt.f32.partialorder %v1171_v57, 0.0 }
 0x404   :  { %v1205_v9 = vmul.f32 0.2, %v1163_v60  ;;  %v1166_v11 = vadd.f32 %v2471_v0, %v1165_v8  ;;  %1946 = vmatmul.mubr.bf16.gmra.mrb[56].mxu1 %v1230_v56  ;;  %vm1189_vm13 = vcmp.gt.f32.partialorder %v1163_v60, 0.0 }
 0x405   :  { %vm1192_vm14 = vcmp.gt.f32.partialorder %v1174_v63, 0.0  ;;  %v1208_v12 = vmul.f32 0.2, %v1174_v63  ;;  %v1223_v14 = vsel %vm1191_vm12, %v1171_v57, %v1207_v62 }
 0x406   :  { %vm1190_vm15 = vcmp.gt.f32.partialorder %v1166_v11, 0.0  ;;  %v1206_v13 = vmul.f32 0.2, %v1166_v11  ;;  %v1221_v16 = vsel %vm1189_vm13, %v1163_v60, %v1205_v9 }
 0x407   :  { %v1224_v15 = vsel %vm1192_vm14, %v1174_v63, %v1208_v12 }
 0x408   :  { %v1222_v17 = vsel %vm1190_vm15, %v1166_v11, %v1206_v13  ;;  %v1232_v18 = vpack.c.bf16 %v1224_v15, %v1223_v14 }
 0x409   :  { %v1231_v19 = vpack.c.bf16 %v1222_v17, %v1221_v16 }
 0x40b   :  { %1949 = vmatprep.mubr.bf16.mxu1 %v1231_v19 }
 0x40c   :  { %1950 = vmatmul.mubr.bf16.gmra.mrb[60].mxu1 %v1232_v18 }
 0x40d   :  { %1977 = vmatprep.mubr.bf16.mxu1 %v2386_v4 }
 0x4c7   :  { %v1939_v20 = vpop.f32.mrb[48].mxu1 }
 0x4c8   :  { %v1331_v21 = vpop.f32.mrb[49].mxu1 }
 0x4c9   :  { %v1940_v22 = vpop.f32.mrb[50].mxu1 }
 0x4ca   :  { %v1395_v0 = vpack.c.bf16 %v1940_v22, %v1939_v20  ;;  %v1334_v23 = vpop.f32.mrb[51].mxu1 }
 0x4cb   :  { %v1394_v24 = vpack.c.bf16 %v1334_v23, %v1331_v21 }
 0x4cd   :  { %1953 = vmatprep.subr.bf16.mxu0 %v1394_v24  ;;  %1985 = vmatprep.subr.bf16.mxu1 %v1394_v24 }
 0x4ce   :  { %1954 = vmatpush3.bf16.msra.mxu0 %v1394_v24  ;;  %1993 = vmatpush3.bf16.msra.mxu1 %v1394_v24 }
 0x4cf   :  { %v1943_v25 = vpop.f32.mrb[52].mxu1  ;;  %1955 = vmatprep.subr.bf16.mxu0 %v1395_v0  ;;  %1986 = vmatprep.subr.bf16.mxu1 %v1395_v0 }
 0x4d0   :  { %v1347_v26 = vpop.f32.mrb[53].mxu1 }
 0x4d1   :  { %v1944_v27 = vpop.f32.mrb[54].mxu1 }
 0x4d2   :  { %v1397_v28 = vpack.c.bf16 %v1944_v27, %v1943_v25  ;;  %v1350_v10 = vpop.f32.mrb[55].mxu1  ;;  %1956 = vmatpush3.bf16.msra.mxu0 %v1395_v0  ;;  %1994 = vmatpush3.bf16.msra.mxu1 %v1395_v0 }
 0x4d3   :  { %v1396_v4 = vpack.c.bf16 %v1350_v10, %v1347_v26 }
 0x4d5   :  { %1957 = vmatprep.subr.bf16.mxu0 %v1396_v4  ;;  %1987 = vmatprep.subr.bf16.mxu1 %v1396_v4 }
 0x4d6   :  { %1958 = vmatpush3.bf16.msra.mxu0 %v1396_v4  ;;  %1995 = vmatpush3.bf16.msra.mxu1 %v1396_v4 }
 0x4d7   :  { %v1947_v29 = vpop.f32.mrb[56].mxu1  ;;  %1959 = vmatprep.subr.bf16.mxu0 %v1397_v28  ;;  %1988 = vmatprep.subr.bf16.mxu1 %v1397_v28 }
 0x4d8   :  { %v1363_v30 = vpop.f32.mrb[57].mxu1 }
 0x4d9   :  { %v1948_v31 = vpop.f32.mrb[58].mxu1 }
 0x4da   :  { %v1399_v32 = vpack.c.bf16 %v1948_v31, %v1947_v29  ;;  %v1366_v33 = vpop.f32.mrb[59].mxu1  ;;  %1960 = vmatpush3.bf16.msra.mxu0 %v1397_v28  ;;  %1996 = vmatpush3.bf16.msra.mxu1 %v1397_v28 }
 0x4db   :  { %v1398_v34 = vpack.c.bf16 %v1366_v33, %v1363_v30 }
 0x4dd   :  { %1961 = vmatprep.subr.bf16.mxu0 %v1398_v34  ;;  %1989 = vmatprep.subr.bf16.mxu1 %v1398_v34 }
 0x4de   :  { %1962 = vmatpush3.bf16.msra.mxu0 %v1398_v34  ;;  %1997 = vmatpush3.bf16.msra.mxu1 %v1398_v34 }
 0x4df   :  { %v1951_v35 = vpop.f32.mrb[60].mxu1  ;;  %1963 = vmatprep.subr.bf16.mxu0 %v1399_v32  ;;  %1990 = vmatprep.subr.bf16.mxu1 %v1399_v32 }
 0x4e0   :  { %v1379_v36 = vpop.f32.mrb[61].mxu1 }
 0x4e1   :  { %v1952_v37 = vpop.f32.mrb[62].mxu1 }
 0x4e2   :  { %v1401_v38 = vpack.c.bf16 %v1952_v37, %v1951_v35  ;;  %v1382_v39 = vpop.f32.mrb[63].mxu1  ;;  %1964 = vmatpush3.bf16.msra.mxu0 %v1399_v32  ;;  %1998 = vmatpush3.bf16.msra.mxu1 %v1399_v32 }
 0x4e3   :  { %v1400_v40 = vpack.c.bf16 %v1382_v39, %v1379_v36 }
 0x4e5   :  { %1965 = vmatprep.subr.bf16.mxu0 %v1400_v40  ;;  %1991 = vmatprep.subr.bf16.mxu1 %v1400_v40 }
 0x4e6   :  { %1966 = vmatpush3.bf16.msra.mxu0 %v1400_v40  ;;  %1999 = vmatpush3.bf16.msra.mxu1 %v1400_v40 }
 0x4e7   :  { %1967 = vmatprep.subr.bf16.mxu0 %v1401_v38  ;;  %1992 = vmatprep.subr.bf16.mxu1 %v1401_v38 }
 0x4ea   :  { %1968 = vmatpush3.bf16.msra.mxu0 %v1401_v38  ;;  %2000 = vmatpush3.bf16.msra.mxu1 %v1401_v38 }
 0x4ed   :  { %1970 = vmatmul.mubr.bf16.vlgmr.msra.gmra.mrb[64].mxu0 %v2369_v1  ;;  %1978 = vmatmul.mubr.bf16.vlgmr.msra.gmra.mrb[64].mxu1 %v2393_v5 }
 0x4ee   :  { %1973 = vmatprep.mubr.bf16.mxu0 %v2374_v2  ;;  %1981 = vmatprep.mubr.bf16.mxu1 %v2398_v6 }
 0x4f5   :  { %1974 = vmatmul.mubr.bf16.gmra.mrb[68].mxu0 %v2381_v3  ;;  %1982 = vmatmul.mubr.bf16.gmra.mrb[68].mxu1 %v2405_v7 }
 0x5c0   :  { %v1971_v42 = vpop.f32.mrb[64].mxu0  ;;  %v1979_v43 = vpop.f32.mrb[64].mxu1 }
 0x5c1   :  { %v1452_v44 = vadd.f32 %v1971_v42, %v1616_v41  ;;  %v1484_v45 = vadd.f32 %v1979_v43, %v1616_v41  ;;  %v1443_v46 = vpop.f32.mrb[65].mxu0  ;;  %v1475_v1 = vpop.f32.mrb[65].mxu1 }
 0x5c2   :  { %v1444_v47 = vadd.f32 %v1616_v41, %v1443_v46  ;;  %v1476_v5 = vadd.f32 %v1616_v41, %v1475_v1  ;;  %v1972_v48 = vpop.f32.mrb[66].mxu0  ;;  %v1980_v2 = vpop.f32.mrb[66].mxu1 }
 0x5c3   :  { %1508 = vst [vmem:[%s2555_s8 + $0x10] sm:$0xff] %v1452_v44  ;;  %1516 = vst [vmem:[%s2555_s8 + $0x50] sm:$0xff] %v1484_v45  ;;  %v1455_v3 = vadd.f32 %v1972_v48, %v1616_v41  ;;  %v1487_v6 = vadd.f32 %v1980_v2, %v1616_v41  ;;  %v1446_v7 = vpop.f32.mrb[67].mxu0  ;;  %v1478_v49 = vpop.f32.mrb[67].mxu1 }
 0x5c4   :  { %1506 = vst [vmem:[%s2555_s8] sm:$0xff] %v1444_v47  ;;  %1514 = vst [vmem:[%s2555_s8 + $0x40] sm:$0xff] %v1476_v5  ;;  %v1447_v50 = vadd.f32 %v1616_v41, %v1446_v7  ;;  %v1479_v51 = vadd.f32 %v1616_v41, %v1478_v49 }
 0x5c5   :  { %1509 = vst [vmem:[%s2555_s8 + $0x18] sm:$0xff] %v1455_v3  ;;  %1517 = vst [vmem:[%s2555_s8 + $0x58] sm:$0xff] %v1487_v6 }
 0x5c6   :  { %1507 = vst [vmem:[%s2555_s8 + $0x8] sm:$0xff] %v1447_v50  ;;  %1515 = vst [vmem:[%s2555_s8 + $0x48] sm:$0xff] %v1479_v51 }
 0x5c8   :  { %v1975_v52 = vpop.f32.mrb[68].mxu0  ;;  %v1983_v53 = vpop.f32.mrb[68].mxu1 }
 0x5c9   :  { %v1468_v54 = vadd.f32 %v1975_v52, %v1616_v41  ;;  %v1500_v55 = vadd.f32 %v1983_v53, %v1616_v41  ;;  %v1459_v56 = vpop.f32.mrb[69].mxu0  ;;  %v1491_v57 = vpop.f32.mrb[69].mxu1 }
 0x5ca   :  { %v1460_v58 = vadd.f32 %v1616_v41, %v1459_v56  ;;  %v1492_v59 = vadd.f32 %v1616_v41, %v1491_v57  ;;  %v1976_v60 = vpop.f32.mrb[70].mxu0  ;;  %v1984_v61 = vpop.f32.mrb[70].mxu1 }
 0x5cb   :  { %1512 = vst [vmem:[%s2555_s8 + $0x30] sm:$0xff] %v1468_v54  ;;  %1520 = vst [vmem:[%s2555_s8 + $0x70] sm:$0xff] %v1500_v55  ;;  %v1471_v62 = vadd.f32 %v1976_v60, %v1616_v41  ;;  %v1503_v63 = vadd.f32 %v1984_v61, %v1616_v41  ;;  %v1462_v8 = vpop.f32.mrb[71].mxu0  ;;  %v1494_v9 = vpop.f32.mrb[71].mxu1 }
 0x5cc   :  { %1510 = vst [vmem:[%s2555_s8 + $0x20] sm:$0xff] %v1460_v58  ;;  %1518 = vst [vmem:[%s2555_s8 + $0x60] sm:$0xff] %v1492_v59  ;;  %v1463_v11 = vadd.f32 %v1616_v41, %v1462_v8  ;;  %v1495_v12 = vadd.f32 %v1616_v41, %v1494_v9 }
 0x5cd   :  { %1513 = vst [vmem:[%s2555_s8 + $0x38] sm:$0xff] %v1471_v62  ;;  %1521 = vst [vmem:[%s2555_s8 + $0x78] sm:$0xff] %v1503_v63 }
 0x5ce   :  { %1511 = vst [vmem:[%s2555_s8 + $0x28] sm:$0xff] %v1463_v11  ;;  %1519 = vst [vmem:[%s2555_s8 + $0x68] sm:$0xff] %v1495_v12 }

</bundles_post_ra>
